<compile_context>
chip_gen: v7x
topology: tpu7x:2x2x1
jax: 0.10.0
libtpu: 0.0.40
codegen_flags: <defaults>
</compile_context>

<pallas_src>
import functools
import math

import numpy as np
import jax
import jax.numpy as jnp
from jax.experimental import pallas as pl
from jax.experimental.pallas import tpu as pltpu

EPS = 1e-12


# --------------------------------------------------------------------------- kernel
def filter_layer_kernel(x_ref, fcat_ref, gre_ref, gim_ref, wre_ref, wim_ref,
                        segsum_ref, segbcast_ref, gamma_ref, beta_ref, o_ref,
                        *, inv_h):
    """One lane tile of TB batch elements, all S tokens.

    x_ref      : (S, TN)      f32    TN = TB * H (batch folded into lanes)
    fcat_ref   : (2*Fkp, S)   bf16   [F_re ; F_im] stacked forward DFT
    gre/gim    : (S, Fkp)     bf16   inverse DFT (real / imag parts)
    wre/wim    : (Fkp, TN)    f32    learnable filter, tiled TB times along lanes
    segsum     : (TN, TBp)    bf16   column b sums the H lanes of segment b (entries 1.0)
    segbcast   : (TBp, TN)    f32    broadcasts per-segment scalars back to lanes
    gamma/beta : (1, TN)      f32    LayerNorm affine, tiled TB times
    o_ref      : (S, TN)      out_dtype
    """
    fkp = wre_ref.shape[0]
    seq = x_ref.shape[0]
    x = x_ref[...]                                                   # (S, TN) f32

    # ---- forward rfft ('ortho') along seq: one fused MXU matmul, f32 accumulation
    xf = jnp.dot(fcat_ref[...], x.astype(fcat_ref.dtype),
                 preferred_element_type=jnp.float32)                 # (2*Fkp, TN)
    x_re = xf[:fkp]
    x_im = xf[fkp:]

    # ---- complex multiply with the learnable filter (f32, VPU)
    y_re = x_re * wre_ref[...] - x_im * wim_ref[...]
    y_im = x_re * wim_ref[...] + x_im * wre_ref[...]

    # ---- inverse rfft ('ortho'): two accumulated matmuls, no VMEM scratch round-trip
    y = jnp.dot(gre_ref[...], y_re.astype(gre_ref.dtype),
                preferred_element_type=jnp.float32)
    y = y + jnp.dot(gim_ref[...], y_im.astype(gim_ref.dtype),
                    preferred_element_type=jnp.float32)              # (S, TN)

    # dropout (eval mode) is identity; residual add in f32
    h = y + x

    # ---- TF-style LayerNorm over each width-H lane segment.
    # Fused mean / E[h^2]: one bf16 segment-sum matmul over [h ; h*h], one small f32
    # broadcast-back matmul, then var = E[h^2] - mean^2 (clamped; f32 accumulation).
    hh = jnp.concatenate([h, h * h], axis=0)                         # (2S, TN) f32
    sums = jnp.dot(hh.astype(segsum_ref.dtype), segsum_ref[...],
                   preferred_element_type=jnp.float32)               # (2S, TBp)
    stats = jnp.dot(sums * inv_h, segbcast_ref[...],
                    preferred_element_type=jnp.float32)              # (2S, TN)
    u = stats[:seq]
    var = jnp.maximum(stats[seq:] - u * u, 0.0)
    normed = (h - u) * jax.lax.rsqrt(var + EPS)
    o_ref[...] = (gamma_ref[...] * normed + beta_ref[...]).astype(o_ref.dtype)


# --------------------------------------------------------------------------- constants
def make_dft_matrices(seq_len, fkp, dtype):
    """Fk-padded rfft / irfft ('ortho') matrices along the sequence axis."""
    S = seq_len
    Fk = S // 2 + 1
    n = np.arange(S)
    k = np.arange(Fk)
    inv_sqrt_s = 1.0 / math.sqrt(S)

    ang_fwd = 2.0 * math.pi * np.outer(k, n) / S                     # (Fk, S)
    f_re = np.zeros((fkp, S), np.float32)
    f_im = np.zeros((fkp, S), np.float32)
    f_re[:Fk] = np.cos(ang_fwd) * inv_sqrt_s
    f_im[:Fk] = -np.sin(ang_fwd) * inv_sqrt_s

    # Hermitian-fold weights: 1 for DC (and Nyquist if S even), 2 otherwise.
    w = np.full((Fk,), 2.0)
    w[0] = 1.0
    if S % 2 == 0:
        w[-1] = 1.0
    ang_inv = 2.0 * math.pi * np.outer(n, k) / S                     # (S, Fk)
    g_re = np.zeros((S, fkp), np.float32)
    g_im = np.zeros((S, fkp), np.float32)
    g_re[:, :Fk] = np.cos(ang_inv) * w[None, :] * inv_sqrt_s
    g_im[:, :Fk] = -np.sin(ang_inv) * w[None, :] * inv_sqrt_s

    f_cat = np.concatenate([f_re, f_im], axis=0)                     # (2*Fkp, S)
    return (jnp.asarray(f_cat, dtype), jnp.asarray(g_re, dtype), jnp.asarray(g_im, dtype))


def _segment_matrices(TB, H):
    """Segment-sum (TN, TBp) bf16 and segment-broadcast (TBp, TN) f32 constants."""
    TN = TB * H
    TBp = ((TB + 7) // 8) * 8
    seg_sum = np.zeros((TN, TBp), np.float32)
    seg_bcast = np.zeros((TBp, TN), np.float32)
    for b in range(TB):
        seg_sum[b * H:(b + 1) * H, b] = 1.0
        seg_bcast[b, b * H:(b + 1) * H] = 1.0
    return jnp.asarray(seg_sum, jnp.bfloat16), jnp.asarray(seg_bcast, jnp.float32)


def _choose_tiling(B, H, lane_target):
    """Pad the batch so B_pad*H % 128 == 0; pick the lane tile TB*H.

    Preference order: (1) an even number (>= 2) of grid steps so v7x can shard the
    'parallel' grid across both TensorCores, (2) the widest tile <= lane_target
    (fewer, bigger steps; ~0.35 us per-step overhead on all generations).
    """
    unit = max(1, 128 // math.gcd(H, 128))          # smallest TB with TB*H % 128 == 0
    b_pad = ((B + unit - 1) // unit) * unit
    cands = [tb for tb in range(unit, b_pad + 1, unit)
             if b_pad % tb == 0 and tb * H <= lane_target]
    if not cands:
        cands = [unit]                              # stay lane-dense even if > lane_target
    even = [tb for tb in cands if (b_pad // tb) % 2 == 0]
    tb = max(even) if even else max(cands)
    return b_pad, tb


def _vmem_limit_bytes(S, TN, fkp, tbp):
    io = 2 * 2 * (S * TN * 4)                                  # double-buffered x + out
    consts = (2 * fkp * S * 2 + 2 * S * fkp * 2 + 2 * fkp * TN * 4
              + TN * tbp * 2 + tbp * TN * 4 + 2 * TN * 4)
    temps = (4 * fkp * TN * 4                                  # xf, y_re/y_im
             + 5 * S * TN * 4 + 2 * S * TN * 2)                # y, h, hh, stats, normed
    est = io + consts + temps
    # v5e default scoped VMEM is only 16 MiB -> raise explicitly; cap under v7x's 64 MiB.
    return int(min(max(2 * est, 32 * 1024 * 1024), 56 * 1024 * 1024))


# --------------------------------------------------------------------------- wrappers
def filter_layer_folded(x2, complex_weight, ln_weight, ln_bias, *, hidden, batch_tile,
                        out_dtype=jnp.float32, spectral_dtype=jnp.bfloat16):
    """Run the kernel on activations already in folded (S, B_pad*H) layout.

    Stacked FMLP blocks should call this directly and keep the folded layout across
    layers (fold/unfold once per model) — the per-layer transpose/reshape otherwise
    triples HBM traffic for this mem-bound layer.
    """
    S, N_pad = x2.shape
    H, TB = hidden, batch_tile
    TN = TB * H
    assert N_pad % TN == 0 and TN % 128 == 0
    n_tiles = N_pad // TN

    Fk = S // 2 + 1
    Fkp = ((Fk + 7) // 8) * 8

    f_cat, g_re, g_im = make_dft_matrices(S, Fkp, spectral_dtype)
    cw = jnp.asarray(complex_weight, jnp.float32)
    w_re = jnp.zeros((Fkp, H), jnp.float32).at[:Fk].set(cw[0, :, :, 0])
    w_im = jnp.zeros((Fkp, H), jnp.float32).at[:Fk].set(cw[0, :, :, 1])
    w_re_t = jnp.tile(w_re, (1, TB))                                 # (Fkp, TN)
    w_im_t = jnp.tile(w_im, (1, TB))
    gamma_t = jnp.tile(jnp.asarray(ln_weight, jnp.float32).reshape(1, H), (1, TB))
    beta_t = jnp.tile(jnp.asarray(ln_bias, jnp.float32).reshape(1, H), (1, TB))
    seg_sum, seg_bcast = _segment_matrices(TB, H)
    TBp = seg_sum.shape[1]

    kernel = functools.partial(filter_layer_kernel, inv_h=float(1.0 / H))

    cost = pl.CostEstimate(
        flops=int(2 * (2 * Fkp) * S * N_pad              # forward DFT
                  + 2 * 2 * Fkp * S * N_pad              # inverse DFT
                  + 2 * 2 * (2 * S) * TBp * N_pad        # LN segment matmuls
                  + 24 * S * N_pad + 6 * Fkp * N_pad),   # elementwise
        transcendentals=int(S * N_pad),
        bytes_accessed=int(S * N_pad * 4 + S * N_pad * jnp.dtype(out_dtype).itemsize
                           + 2 * Fkp * TN * 4 + 4 * Fkp * S * 2 + 2 * TN * TBp * 4),
    )

    def const2d(arr):
        return pl.BlockSpec(arr.shape, lambda j: (0, 0))

    out2 = pl.pallas_call(
        kernel,
        out_shape=jax.ShapeDtypeStruct((S, N_pad), out_dtype),
        grid_spec=pltpu.PrefetchScalarGridSpec(
            num_scalar_prefetch=0,
            grid=(n_tiles,),
            in_specs=[
                pl.BlockSpec((S, TN), lambda j: (0, j)),             # x (lane-folded)
                const2d(f_cat), const2d(g_re), const2d(g_im),        # DFT matrices
                const2d(w_re_t), const2d(w_im_t),                    # filter (tiled)
                const2d(seg_sum), const2d(seg_bcast),                # LN segment matmuls
                const2d(gamma_t), const2d(beta_t),                   # LN affine (tiled)
            ],
            out_specs=pl.BlockSpec((S, TN), lambda j: (0, j)),
        ),
        compiler_params=pltpu.CompilerParams(
            dimension_semantics=("parallel",),
            vmem_limit_bytes=_vmem_limit_bytes(S, TN, Fkp, TBp)),
        cost_estimate=cost,
    )(x2, f_cat, g_re, g_im, w_re_t, w_im_t, seg_sum, seg_bcast, gamma_t, beta_t)
    return out2


def filter_layer(x, complex_weight, ln_weight, ln_bias, *, lane_target=2048,
                 out_dtype=jnp.float32, spectral_dtype=jnp.bfloat16):
    """x: (B, S, H) f32. complex_weight: (1, S//2+1, H, 2). Matches FilterLayer.forward."""
    B, S, H = x.shape
    B_pad, TB = _choose_tiling(B, H, lane_target)
    N_pad = B_pad * H

    x = x.astype(jnp.float32)
    if B_pad != B:
        x = jnp.concatenate([x, jnp.zeros((B_pad - B, S, H), jnp.float32)], axis=0)

    # Fold batch into lanes: (B_pad, S, H) -> (S, B_pad*H).  Layout plumbing only;
    # a stacked FMLP model should do this once and use filter_layer_folded per block.
    x2 = jnp.transpose(x, (1, 0, 2)).reshape(S, N_pad)

    out2 = filter_layer_folded(x2, complex_weight, ln_weight, ln_bias,
                               hidden=H, batch_tile=TB,
                               out_dtype=out_dtype, spectral_dtype=spectral_dtype)

    out = jnp.transpose(out2.reshape(S, B_pad, H), (1, 0, 2))
    return out[:B]


# --------------------------------------------------------------------------- reference
def filter_layer_reference(x, complex_weight, ln_weight, ln_bias):
    """Pure-JAX f32 reference matching the PyTorch module (eval mode)."""
    B, S, H = x.shape
    xf = jnp.fft.rfft(x, axis=1, norm="ortho")
    w = complex_weight[..., 0] + 1j * complex_weight[..., 1]         # (1, Fk, H)
    xf = xf * w
    y = jnp.fft.irfft(xf, n=S, axis=1, norm="ortho")
    h = y + x
    u = jnp.mean(h, axis=-1, keepdims=True)
    s = jnp.mean((h - u) ** 2, axis=-1, keepdims=True)
    normed = (h - u) / jnp.sqrt(s + EPS)
    return ln_weight * normed + ln_bias


def _run_case(key, B, S, H, rtol, atol):
    k_x, k_w, k_g, k_b = jax.random.split(key, 4)
    x = jax.random.normal(k_x, (B, S, H), dtype=jnp.float32)
    complex_weight = jax.random.normal(k_w, (1, S // 2 + 1, H, 2), dtype=jnp.float32) * 0.02
    ln_weight = 1.0 + 0.1 * jax.random.normal(k_g, (H,), dtype=jnp.float32)
    ln_bias = 0.1 * jax.random.normal(k_b, (H,), dtype=jnp.float32)

    out = jax.block_until_ready(filter_layer(x, complex_weight, ln_weight, ln_bias))
    ref = filter_layer_reference(x, complex_weight, ln_weight, ln_bias)
    np.testing.assert_allclose(np.asarray(out), np.asarray(ref), rtol=rtol, atol=atol)


if __name__ == "__main__":
    key = jax.random.PRNGKey(0)
    k1, k2, k3 = jax.random.split(key, 3)
    # bf16 MXU path -> relaxed tolerance vs the f32 reference.
    _run_case(k1, B=2, S=8, H=32, rtol=2e-2, atol=2e-2)    # batch padded 2->4, one 128-lane tile
    _run_case(k2, B=32, S=16, H=32, rtol=2e-2, atol=2e-2)  # TN=512, 2 'parallel' grid steps (v7x TCs)
    _run_case(k3, B=5, S=8, H=48, rtol=2e-2, atol=2e-2)    # non-pow2 H + batch padding path
    print("KERNEL_OK")
</pallas_src>

<mosaic_0001>
module attributes {stable_mosaic.version = 11 : i64} {
  func.func @filter_layer_kernel(%arg0: i32, %arg1: memref<8x128xf32, #tpu.memory_space<vmem>>, %arg2: memref<16x8xbf16, #tpu.memory_space<vmem>>, %arg3: memref<8x8xbf16, #tpu.memory_space<vmem>>, %arg4: memref<8x8xbf16, #tpu.memory_space<vmem>>, %arg5: memref<8x128xf32, #tpu.memory_space<vmem>>, %arg6: memref<8x128xf32, #tpu.memory_space<vmem>>, %arg7: memref<128x8xbf16, #tpu.memory_space<vmem>>, %arg8: memref<8x128xf32, #tpu.memory_space<vmem>>, %arg9: memref<1x128xf32, #tpu.memory_space<vmem>>, %arg10: memref<1x128xf32, #tpu.memory_space<vmem>>, %arg11: memref<8x128xf32, #tpu.memory_space<vmem>>) attributes {dimension_semantics = [#tpu.dimension_semantics<parallel>], iteration_bounds = array<i64: 1>, scalar_prefetch = 0 : i64, scratch_operands = 0 : i64, tpu.core_type = #tpu.core_type<tc>, window_params = [{transform_indices = @transform_0, window_bounds = array<i64: 8, 128>}, {pipeline_mode = #tpu.pipeline_mode<synchronous>, transform_indices = @transform_1, window_bounds = array<i64: 16, 8>}, {pipeline_mode = #tpu.pipeline_mode<synchronous>, transform_indices = @transform_2, window_bounds = array<i64: 8, 8>}, {pipeline_mode = #tpu.pipeline_mode<synchronous>, transform_indices = @transform_3, window_bounds = array<i64: 8, 8>}, {pipeline_mode = #tpu.pipeline_mode<synchronous>, transform_indices = @transform_4, window_bounds = array<i64: 8, 128>}, {pipeline_mode = #tpu.pipeline_mode<synchronous>, transform_indices = @transform_5, window_bounds = array<i64: 8, 128>}, {pipeline_mode = #tpu.pipeline_mode<synchronous>, transform_indices = @transform_6, window_bounds = array<i64: 128, 8>}, {pipeline_mode = #tpu.pipeline_mode<synchronous>, transform_indices = @transform_7, window_bounds = array<i64: 8, 128>}, {pipeline_mode = #tpu.pipeline_mode<synchronous>, transform_indices = @transform_8, window_bounds = array<i64: 1, 128>}, {pipeline_mode = #tpu.pipeline_mode<synchronous>, transform_indices = @transform_9, window_bounds = array<i64: 1, 128>}, {transform_indices = @transform_10, window_bounds = array<i64: 8, 128>}]} {
    %c0 = arith.constant 0 : index
    %c0_0 = arith.constant 0 : index
    %0 = vector.load %arg1[%c0, %c0_0] : memref<8x128xf32, #tpu.memory_space<vmem>>, vector<8x128xf32>
    %c0_1 = arith.constant 0 : index
    %c0_2 = arith.constant 0 : index
    %1 = vector.load %arg2[%c0_1, %c0_2] : memref<16x8xbf16, #tpu.memory_space<vmem>>, vector<16x8xbf16>
    %2 = arith.truncf %0 : vector<8x128xf32> to vector<8x128xbf16>
    %cst = arith.constant dense<0.000000e+00> : vector<16x128xf32>
    %3 = tpu.matmul %1, %2, %cst {dimension_numbers = #tpu.dot_dimension_numbers<[1], [0], [0], [1], [0, 0, 1, 1], [], []>} : vector<16x8xbf16>, vector<8x128xbf16>, vector<16x128xf32> -> vector<16x128xf32>
    %4 = vector.extract_strided_slice %3 {offsets = [0, 0], sizes = [8, 128], strides = [1, 1]} : vector<16x128xf32> to vector<8x128xf32>
    %5 = vector.extract_strided_slice %3 {offsets = [8, 0], sizes = [8, 128], strides = [1, 1]} : vector<16x128xf32> to vector<8x128xf32>
    %c0_3 = arith.constant 0 : index
    %c0_4 = arith.constant 0 : index
    %6 = vector.load %arg5[%c0_3, %c0_4] : memref<8x128xf32, #tpu.memory_space<vmem>>, vector<8x128xf32>
    %7 = arith.mulf %4, %6 : vector<8x128xf32>
    %c0_5 = arith.constant 0 : index
    %c0_6 = arith.constant 0 : index
    %8 = vector.load %arg6[%c0_5, %c0_6] : memref<8x128xf32, #tpu.memory_space<vmem>>, vector<8x128xf32>
    %9 = arith.mulf %5, %8 : vector<8x128xf32>
    %10 = arith.subf %7, %9 : vector<8x128xf32>
    %c0_7 = arith.constant 0 : index
    %c0_8 = arith.constant 0 : index
    %11 = vector.load %arg6[%c0_7, %c0_8] : memref<8x128xf32, #tpu.memory_space<vmem>>, vector<8x128xf32>
    %12 = arith.mulf %4, %11 : vector<8x128xf32>
    %c0_9 = arith.constant 0 : index
    %c0_10 = arith.constant 0 : index
    %13 = vector.load %arg5[%c0_9, %c0_10] : memref<8x128xf32, #tpu.memory_space<vmem>>, vector<8x128xf32>
    %14 = arith.mulf %5, %13 : vector<8x128xf32>
    %15 = arith.addf %12, %14 : vector<8x128xf32>
    %c0_11 = arith.constant 0 : index
    %c0_12 = arith.constant 0 : index
    %16 = vector.load %arg3[%c0_11, %c0_12] : memref<8x8xbf16, #tpu.memory_space<vmem>>, vector<8x8xbf16>
    %17 = arith.truncf %10 : vector<8x128xf32> to vector<8x128xbf16>
    %cst_13 = arith.constant dense<0.000000e+00> : vector<8x128xf32>
    %18 = tpu.matmul %16, %17, %cst_13 {dimension_numbers = #tpu.dot_dimension_numbers<[1], [0], [0], [1], [0, 0, 1, 1], [], []>} : vector<8x8xbf16>, vector<8x128xbf16>, vector<8x128xf32> -> vector<8x128xf32>
    %c0_14 = arith.constant 0 : index
    %c0_15 = arith.constant 0 : index
    %19 = vector.load %arg4[%c0_14, %c0_15] : memref<8x8xbf16, #tpu.memory_space<vmem>>, vector<8x8xbf16>
    %20 = arith.truncf %15 : vector<8x128xf32> to vector<8x128xbf16>
    %cst_16 = arith.constant dense<0.000000e+00> : vector<8x128xf32>
    %21 = tpu.matmul %19, %20, %cst_16 {dimension_numbers = #tpu.dot_dimension_numbers<[1], [0], [0], [1], [0, 0, 1, 1], [], []>} : vector<8x8xbf16>, vector<8x128xbf16>, vector<8x128xf32> -> vector<8x128xf32>
    %22 = arith.addf %18, %21 : vector<8x128xf32>
    %23 = arith.addf %22, %0 : vector<8x128xf32>
    %24 = arith.mulf %23, %23 : vector<8x128xf32>
    %25 = tpu.concatenate %23, %24 in 0 : vector<8x128xf32>, vector<8x128xf32> -> vector<16x128xf32>
    %26 = arith.truncf %25 : vector<16x128xf32> to vector<16x128xbf16>
    %c0_17 = arith.constant 0 : index
    %c0_18 = arith.constant 0 : index
    %27 = vector.load %arg7[%c0_17, %c0_18] : memref<128x8xbf16, #tpu.memory_space<vmem>>, vector<128x8xbf16>
    %cst_19 = arith.constant dense<0.000000e+00> : vector<16x8xf32>
    %28 = tpu.matmul %26, %27, %cst_19 {dimension_numbers = #tpu.dot_dimension_numbers<[1], [0], [0], [1], [0, 0, 1, 1], [], []>} : vector<16x128xbf16>, vector<128x8xbf16>, vector<16x8xf32> -> vector<16x8xf32>
    %cst_20 = arith.constant 3.125000e-02 : f32
    %29 = vector.broadcast %cst_20 : f32 to vector<16x8xf32>
    %30 = arith.mulf %28, %29 : vector<16x8xf32>
    %c0_21 = arith.constant 0 : index
    %c0_22 = arith.constant 0 : index
    %31 = vector.load %arg8[%c0_21, %c0_22] : memref<8x128xf32, #tpu.memory_space<vmem>>, vector<8x128xf32>
    %cst_23 = arith.constant dense<0.000000e+00> : vector<16x128xf32>
    %32 = tpu.matmul %30, %31, %cst_23 {dimension_numbers = #tpu.dot_dimension_numbers<[1], [0], [0], [1], [0, 0, 1, 1], [], []>} : vector<16x8xf32>, vector<8x128xf32>, vector<16x128xf32> -> vector<16x128xf32>
    %33 = vector.extract_strided_slice %32 {offsets = [0, 0], sizes = [8, 128], strides = [1, 1]} : vector<16x128xf32> to vector<8x128xf32>
    %34 = vector.extract_strided_slice %32 {offsets = [8, 0], sizes = [8, 128], strides = [1, 1]} : vector<16x128xf32> to vector<8x128xf32>
    %35 = arith.mulf %33, %33 : vector<8x128xf32>
    %36 = arith.subf %34, %35 : vector<8x128xf32>
    %cst_24 = arith.constant 0.000000e+00 : f32
    %37 = vector.broadcast %cst_24 : f32 to vector<8x128xf32>
    %38 = arith.maximumf %36, %37 : vector<8x128xf32>
    %39 = arith.subf %23, %33 : vector<8x128xf32>
    %cst_25 = arith.constant 9.99999996E-13 : f32
    %40 = vector.broadcast %cst_25 : f32 to vector<8x128xf32>
    %41 = arith.addf %38, %40 : vector<8x128xf32>
    %42 = math.rsqrt %41 : vector<8x128xf32>
    %43 = arith.mulf %39, %42 : vector<8x128xf32>
    %c0_26 = arith.constant 0 : index
    %c0_27 = arith.constant 0 : index
    %44 = vector.load %arg9[%c0_26, %c0_27] : memref<1x128xf32, #tpu.memory_space<vmem>>, vector<1x128xf32>
    %45 = vector.broadcast %44 : vector<1x128xf32> to vector<8x128xf32>
    %46 = arith.mulf %45, %43 : vector<8x128xf32>
    %c0_28 = arith.constant 0 : index
    %c0_29 = arith.constant 0 : index
    %47 = vector.load %arg10[%c0_28, %c0_29] : memref<1x128xf32, #tpu.memory_space<vmem>>, vector<1x128xf32>
    %48 = vector.broadcast %47 : vector<1x128xf32> to vector<8x128xf32>
    %49 = arith.addf %46, %48 : vector<8x128xf32>
    %c0_30 = arith.constant 0 : index
    %c0_31 = arith.constant 0 : index
    %50 = vector.load %arg11[%c0_30, %c0_31] : memref<8x128xf32, #tpu.memory_space<vmem>>, vector<8x128xf32>
    tpu.vector_store %arg11[%c0_30, %c0_31], %49 {strides = array<i32>} : memref<8x128xf32, #tpu.memory_space<vmem>>, vector<8x128xf32>,
    return
  }
  func.func @transform_0(%arg0: i32) -> (i32, i32) {
    %c0_i32 = arith.constant 0 : i32
    %c0_i32_0 = arith.constant 0 : i32
    return %c0_i32, %arg0 : i32, i32
  }
  func.func @transform_1(%arg0: i32) -> (i32, i32) {
    %c0_i32 = arith.constant 0 : i32
    %c0_i32_0 = arith.constant 0 : i32
    %c0_i32_1 = arith.constant 0 : i32
    return %c0_i32, %c0_i32_0 : i32, i32
  }
  func.func @transform_2(%arg0: i32) -> (i32, i32) {
    %c0_i32 = arith.constant 0 : i32
    %c0_i32_0 = arith.constant 0 : i32
    %c0_i32_1 = arith.constant 0 : i32
    return %c0_i32, %c0_i32_0 : i32, i32
  }
  func.func @transform_3(%arg0: i32) -> (i32, i32) {
    %c0_i32 = arith.constant 0 : i32
    %c0_i32_0 = arith.constant 0 : i32
    %c0_i32_1 = arith.constant 0 : i32
    return %c0_i32, %c0_i32_0 : i32, i32
  }
  func.func @transform_4(%arg0: i32) -> (i32, i32) {
    %c0_i32 = arith.constant 0 : i32
    %c0_i32_0 = arith.constant 0 : i32
    %c0_i32_1 = arith.constant 0 : i32
    return %c0_i32, %c0_i32_0 : i32, i32
  }
  func.func @transform_5(%arg0: i32) -> (i32, i32) {
    %c0_i32 = arith.constant 0 : i32
    %c0_i32_0 = arith.constant 0 : i32
    %c0_i32_1 = arith.constant 0 : i32
    return %c0_i32, %c0_i32_0 : i32, i32
  }
  func.func @transform_6(%arg0: i32) -> (i32, i32) {
    %c0_i32 = arith.constant 0 : i32
    %c0_i32_0 = arith.constant 0 : i32
    %c0_i32_1 = arith.constant 0 : i32
    return %c0_i32, %c0_i32_0 : i32, i32
  }
  func.func @transform_7(%arg0: i32) -> (i32, i32) {
    %c0_i32 = arith.constant 0 : i32
    %c0_i32_0 = arith.constant 0 : i32
    %c0_i32_1 = arith.constant 0 : i32
    return %c0_i32, %c0_i32_0 : i32, i32
  }
  func.func @transform_8(%arg0: i32) -> (i32, i32) {
    %c0_i32 = arith.constant 0 : i32
    %c0_i32_0 = arith.constant 0 : i32
    %c0_i32_1 = arith.constant 0 : i32
    return %c0_i32, %c0_i32_0 : i32, i32
  }
  func.func @transform_9(%arg0: i32) -> (i32, i32) {
    %c0_i32 = arith.constant 0 : i32
    %c0_i32_0 = arith.constant 0 : i32
    %c0_i32_1 = arith.constant 0 : i32
    return %c0_i32, %c0_i32_0 : i32, i32
  }
  func.func @transform_10(%arg0: i32) -> (i32, i32) {
    %c0_i32 = arith.constant 0 : i32
    %c0_i32_0 = arith.constant 0 : i32
    return %c0_i32, %arg0 : i32, i32
  }
}

</mosaic_0001>

<bundles_post_ra>
// kernel: tpu_custom_call.1
= control target key start
LH: loop header
LB: loop body
LE: loop exit
PB: predicated region body
PF: predicated region fallthrough
CT: control target
= control target key end

     0   :  { %vm50_vm0 = vcmask 1043456   ;;  %v544_v1 = vmov 0.0   ;;  %vm545_vm1 = vmmov 0   ;;  %vm46_vm2 = vcmask 64512   ;;  %s682_s0 = inlined_call_operand.vmem [shape: f32[8,128], index: 0, kind: input, shape index: {}]   ;;  %s683_s1 = inlined_call_operand.vmem [shape: bf16[16,8], index: 1, kind: input, shape index: {}]   ;;  %s684_s2 = inlined_call_operand.vmem [shape: bf16[8,8], index: 2, kind: input, shape index: {}]   ;;  %s685_s3 = inlined_call_operand.vmem [shape: bf16[8,8], index: 3, kind: input, shape index: {}]   ;;  %s686_s4 = inlined_call_operand.vmem [shape: f32[8,128], index: 4, kind: input, shape index: {}]   ;;  %s687_s5 = inlined_call_operand.vmem [shape: f32[8,128], index: 5, kind: input, shape index: {}]   ;;  %s688_s6 = inlined_call_operand.vmem [shape: bf16[128,8], index: 6, kind: input, shape index: {}]   ;;  %s689_s7 = inlined_call_operand.vmem [shape: f32[8,128], index: 7, kind: input, shape index: {}]   ;;  %s690_s8 = inlined_call_operand.vmem [shape: f32[1,128], index: 8, kind: input, shape index: {}]   ;;  %s691_s9 = inlined_call_operand.vmem [shape: f32[1,128], index: 9, kind: input, shape index: {}]   ;;  %s692_s10 = inlined_call_operand.hbm [shape: f32[8,128], index: 10, kind: output, shape index: {}]  }
   0x1   :  { %v605_v0 = vld [vmem:[%s682_s0] sm:$0xff]  ;;  %463 = vmatprep.subr.bf16.mxu0 %v544_v1  ;;  %465 = vmatprep.mubr.msk.bf16.mxu0 %vm545_vm1, %v544_v1 }
   0x2   :  { %v40_v2 = vpack.c.bf16 %v605_v0, %v605_v0  ;;  %v509_v3 = vld [vmem:[%s683_s1] sm:$0xff]   ;;  %481 = vmatprep.subr.bf16.mxu1 %v544_v1  ;;  %497 = vmatprep.mubr.msk.bf16.mxu1 %vm545_vm1, %v544_v1 }
   0x4   :  { %v52_v4 = vsel %vm50_vm0, %v40_v2, 0 }
   0x5   :  { %464 = vmatpush3.bf16.msra.mxu0 %v52_v4 }
   0x6   :  { %469 = vmatprep.subr.bf16.mxu0 %v544_v1 }
   0x8   :  { %466 = vmatmul.mubr.msk.bf16.vlgmr.msra.gmra.mrb[0].mxu0 %vm46_vm2, %v509_v3 }
   0x9   :  { %15 = vsyncpa [#allocation3], 0  ;;  %471 = vmatprep.mubr.msk.bf16.mxu0 %vm545_vm1, %v544_v1  ;;  %v510_v5 = vld [vmem:[%s688_s6] sm:$0xff]   ;;  %v511_v6 = vld [vmem:[%s688_s6 + $0x8] sm:$0xff]   ;;  %s546_s18 = smov [#allocation2]  }
   0xa   :  { %482 = vmatpush3.bf16.msra.mxu1 %v510_v5  ;;  %v512_v7 = vld [vmem:[%s688_s6 + $0x10] sm:$0xff]   ;;  %v513_v8 = vld [vmem:[%s688_s6 + $0x18] sm:$0xff]   ;;  %v95_v10 = vld [vmem:[%s686_s4] sm:$0xff]  ;;  %s421_s1 = sshll.u32 %s546_s18, 4  ;;  %s422_s1 = int_to_ptr.vmem [resolvable:$true] %s421_s1 }
   0xb   :  { %483 = vmatprep.subr.bf16.mxu1 %v544_v1  ;;  %v97_v11 = vld [vmem:[%s687_s5] sm:$0xff]  ;;  %v515_v28 = vld [vmem:[%s688_s6 + $0x28] sm:$0xff]   ;;  %v516_v29 = vld [vmem:[%s688_s6 + $0x30] sm:$0xff]   ;;  %s520_s19 = scalar_lea.vmem %s422_s1, 128  ;;  %p525_p1 = scmp.lt.s32.totalorder %s422_s1, %s422_s1 }
   0xc   :  { %v105_v24 = vld [vmem:[%s685_s3] sm:$0xf]  ;;  %v517_v30 = vld [vmem:[%s688_s6 + $0x38] sm:$0xff]   ;;  %p521_p0 = scmp.ne.s32.totalorder %s422_s1, %s520_s19  ;;  %p526_p2 = scmp.lt.s32.totalorder %s520_s19, %s520_s19 }
   0xd   :  { %v103_v26 = vld [vmem:[%s684_s2] sm:$0xf] }
   0xe   :  { %484 = vmatpush3.bf16.msra.mxu1 %v511_v6  ;;  %v514_v27 = vld [vmem:[%s688_s6 + $0x20] sm:$0xff]   ;;  %p527_p3 = por %p526_p2, %p525_p1 }
   0xf   :  { %485 = vmatprep.subr.bf16.mxu1 %v544_v1  ;;  %v309_v43 = vld [vmem:[%s689_s7] sm:$0xff] }
  0x10   :  { %v443_v58 = vld [vmem:[%s690_s8] ss:$0 sm:$0xff]  ;;  %p528_p4 = pnand %p527_p3, %p521_p0 }
  0x11   :  { %v444_v60 = vld [vmem:[%s691_s9] ss:$0 sm:$0xff] }
  0x12   :  { %486 = vmatpush3.bf16.msra.mxu1 %v512_v7 }
  0x13   :  { %487 = vmatprep.subr.bf16.mxu1 %v544_v1 }
  0x16   :  { %488 = vmatpush3.bf16.msra.mxu1 %v513_v8 }
  0x17   :  { %489 = vmatprep.subr.bf16.mxu1 %v544_v1 }
  0x1a   :  { %490 = vmatpush3.bf16.msra.mxu1 %v514_v27 }
  0x1b   :  { %491 = vmatprep.subr.bf16.mxu1 %v544_v1 }
  0x1e   :  { %492 = vmatpush3.bf16.msra.mxu1 %v515_v28 }
  0x1f   :  { %493 = vmatprep.subr.bf16.mxu1 %v544_v1 }
  0x22   :  { %494 = vmatpush3.bf16.msra.mxu1 %v516_v29 }
  0x23   :  { %495 = vmatprep.subr.bf16.mxu1 %v544_v1 }
  0x26   :  { %496 = vmatpush3.bf16.msra.mxu1 %v517_v30 }
  0xdb   :  { %v88_v9 = vpop.f32.mrb[0].mxu0 }
  0xdc   :  { %v467_v12 = vpop.f32.mrb[1].mxu0  ;;  %v96_v14 = vmul.f32 %v95_v10, %v88_v9  ;;  %v100_v15 = vmul.f32 %v97_v11, %v88_v9 }
  0xdd   :  { %v91_v13 = vpop.f32.mrb[2].mxu0 }
  0xde   :  { %v98_v16 = vmul.f32 %v97_v11, %v91_v13  ;;  %v101_v17 = vmul.f32 %v95_v10, %v91_v13  ;;  %v468_v18 = vpop.f32.mrb[3].mxu0 }
  0xe0   :  { %v99_v19 = vsub.f32 %v96_v14, %v98_v16  ;;  %v102_v20 = vadd.f32 %v101_v17, %v100_v15 }
  0xe2   :  { %v106_v21 = vpack.c.bf16 %v102_v20, %v102_v20  ;;  %v104_v22 = vpack.c.bf16 %v99_v19, %v99_v19 }
  0xe4   :  { %v111_v23 = vsel %vm50_vm0, %v106_v21, 0  ;;  %v157_v25 = vsel %vm50_vm0, %v104_v22, 0 }
  0xe5   :  { %470 = vmatpush3.bf16.msra.mxu0 %v111_v23 }
  0xe6   :  { %475 = vmatprep.subr.bf16.mxu0 %v544_v1 }
  0xe8   :  { %472 = vmatmul.mubr.msk.bf16.vlgmr.msra.gmra.mrb[4].mxu0 %vm46_vm2, %v105_v24 }
  0xe9   :  { %476 = vmatpush3.bf16.msra.mxu0 %v157_v25  ;;  %477 = vmatprep.mubr.msk.bf16.mxu0 %vm545_vm1, %v544_v1 }
  0xea   :  { %501 = vmatprep.subr.mxu0 %v309_v43 }
  0xf0   :  { %478 = vmatmul.mubr.msk.bf16.vlgmr.msra.gmra.mrb[8].mxu0 %vm46_vm2, %v103_v26 }
  0xf1   :  { %502 = vmatpush3.msra.mxu0 %v309_v43 }
 0x1bb   :  { %v147_v31 = vpop.f32.mrb[4].mxu0 }
 0x1bc   :  { %v473_v32 = vpop.f32.mrb[5].mxu0 }
 0x1bd   :  { %v150_v33 = vpop.f32.mrb[6].mxu0 }
 0x1be   :  { %v474_v34 = vpop.f32.mrb[7].mxu0 }
 0x1c3   :  { %v193_v35 = vpop.f32.mrb[8].mxu0 }
 0x1c4   :  { %v194_v36 = vadd.f32 %v193_v35, %v147_v31  ;;  %v479_v37 = vpop.f32.mrb[9].mxu0 }
 0x1c5   :  { %v196_v38 = vpop.f32.mrb[10].mxu0 }
 0x1c6   :  { %v199_v39 = vadd.f32 %v194_v36, %v605_v0  ;;  %v480_v40 = vpop.f32.mrb[11].mxu0 }
 0x1c8   :  { %v200_v41 = vmul.f32 %v199_v39, %v199_v39 }
 0x1ca   :  { %v201_v42 = vpack.c.bf16 %v200_v41, %v199_v39 }
 0x1cc   :  { %498 = vmatmul.mubr.bf16.vlgmr.msra.gmra.mrb[0].mxu1 %v201_v42 }
 0x29f   :  { %v300_v44 = vpop.f32.mrb[0].mxu1 }
 0x2a0   :  { %v307_v45 = vmul.f32 0.03125, %v300_v44  ;;  %v499_v46 = vpop.f32.mrb[1].mxu1 }
 0x2a1   :  { %v303_v47 = vpop.f32.mrb[2].mxu1 }
 0x2a2   :  { %v308_v48 = vmul.f32 0.03125, %v303_v47  ;;  %v500_v49 = vpop.f32.mrb[3].mxu1  ;;  %503 = vmatprep.mubr.msk.f32.mxu0 %vm46_vm2, %v307_v45 }
 0x2a4   :  { %504 = vmatmul.mubr.msk.f32.vlgmr.msra.gmra.mrb[12].mxu0 %vm46_vm2, %v308_v48 }
 0x377   :  { %v505_v50 = vpop.f32.mrb[12].mxu0 }
 0x378   :  { %v382_v51 = vpop.f32.mrb[13].mxu0 }
 0x379   :  { %v391_v52 = vmul.f32 %v382_v51, %v382_v51  ;;  %v394_v56 = vsub.f32 %v199_v39, %v382_v51 }
 0x37b   :  { %v392_v53 = vsub.f32 %v505_v50, %v391_v52 }
 0x37d   :  { %v393_v54 = vmax.f32 %v392_v53, 0.0 }
 0x37f   :  { %v395_v55 = vadd.f32 1e-12, %v393_v54 }
 0x381   :  { %518 = vrsqrt.f32 %v395_v55 }
 0x38b   :  { %v519_v57 = vpop.eup %518 }
 0x38c   :  { %v397_v59 = vmul.f32 %v519_v57, %v394_v56 }
 0x38e   :  { %v405_v61 = vmul.f32 %v443_v58, %v397_v59 }
 0x390   :  { %v413_v62 = vadd.f32 %v444_v60, %v405_v61 }
 0x392   :  { %414 = vst [vmem:[#allocation2] sm:$0xff] %v413_v62 }
 0x393   :  { %531 = shalt.err (!%p528_p4)
}
 0x394   :  { %s532_s21 = scalar_lea.hbm %s692_s10, 128 }
 0x395   :  { %p533_p5 = scmp.ne.s32.totalorder %s692_s10, %s532_s21  ;;  %p536_p6 = scmp.lt.u32.totalorder %s532_s21, %s692_s10 }
 0x397   :  { %p538_p7 = pnand %p536_p6, %p533_p5 }
 0x399   :  { %541 = shalt.err (!%p538_p7)
}
 0x39a   :  { %424 = dma.vmem_to_hbm [thread:$0]  %s422_s1, 128, %s692_s10, [#allocation3]  }
 0x39b   :  { %542 = dma.done.wait [#allocation3], 128  }
 0x39c   :  { %543 = vsyncadd [#allocation3], 4294967168 }
 0x39d   :  { %428 = vsyncpa [#allocation3], 1 }

</bundles_post_ra>
